<compile_context>
chip_gen: v6e
topology: v6e:2x2x1
jax: 0.10.0
libtpu: 0.0.40
codegen_flags: <defaults>
</compile_context>

<pallas_src>
import functools

import jax
import jax.numpy as jnp
from jax.experimental import pallas as pl
from jax.experimental.pallas import tpu as pltpu


def _pos_embed_kernel(x_ref, pos_ref, o_ref, sig_ref):
    # grid = (l_tile, batch); batch is the innermost axis.  The pos block only
    # changes when the l_tile index changes, so compute sigmoid once per tile
    # and reuse the cached result for every batch step.
    @pl.when(pl.program_id(1) == 0)
    def _():
        sig_ref[...] = jax.nn.sigmoid(
            pos_ref[...].astype(jnp.float32)).astype(sig_ref.dtype)

    o_ref[...] = x_ref[...] + sig_ref[...]


@functools.partial(jax.jit, static_argnames=("tile_bytes",))
def positional_embedding_forward(x, pos_embedding, *, tile_bytes=2 << 20):
    """x: [B, L, D], pos_embedding: [1, L, D] -> x + sigmoid(pos_embedding)."""
    B, L, D = x.shape
    assert pos_embedding.shape == (1, L, D), pos_embedding.shape

    # Sequence tile: either the full L (full-extent dims are exempt from the
    # (8, 128) divisibility rule) or a multiple of 8 sized to ~tile_bytes of x.
    row_bytes = D * x.dtype.itemsize
    tl = max(8, (tile_bytes // max(row_bytes, 1)) // 8 * 8)
    if tl >= L:
        TL, num_l = L, 1
    else:
        TL = tl
        num_l = (L + TL - 1) // TL  # boundary block clipped by the pipeline

    grid = (num_l, B)

    out = pl.pallas_call(
        _pos_embed_kernel,
        out_shape=jax.ShapeDtypeStruct((B, L, D), x.dtype),
        grid=grid,
        in_specs=[
            pl.BlockSpec((1, TL, D), lambda l, b: (b, l, 0)),  # x tile
            pl.BlockSpec((1, TL, D), lambda l, b: (0, l, 0)),  # pos (b-invariant)
        ],
        out_specs=pl.BlockSpec((1, TL, D), lambda l, b: (b, l, 0)),
        scratch_shapes=[pltpu.VMEM((1, TL, D), x.dtype)],  # sigmoid(pos) cache
        compiler_params=pltpu.CompilerParams(
            dimension_semantics=("parallel", "arbitrary"),
            vmem_limit_bytes=32 * 1024 * 1024,
        ),
        # Note: pass input_output_aliases={0: 0} here if the caller can donate x.
    )(x, pos_embedding)

    return out


def init_pos_embedding(key, max_len, d_model):
    # Stand-in for nn.init.kaiming_normal_ on a (1, max_len, d_model) tensor:
    # PyTorch computes fan_in = max_len * d_model, gain = sqrt(2) (leaky_relu a=0).
    std = jnp.sqrt(2.0 / (max_len * d_model))
    return std * jax.random.normal(key, (1, max_len, d_model), dtype=jnp.float32)


if __name__ == "__main__":
    key = jax.random.PRNGKey(0)
    k_pos, k_x, k_pos2, k_x2, k_pos3, k_x3 = jax.random.split(key, 6)

    # 1) Small config consistent with the module: batch=2, seq=8, hidden=32.
    batch, max_len, d_model = 2, 8, 32
    pos_embedding = init_pos_embedding(k_pos, max_len, d_model)
    x = jax.random.normal(k_x, (batch, max_len, d_model), dtype=jnp.float32)

    out = jax.block_until_ready(positional_embedding_forward(x, pos_embedding))
    ref = x + jax.nn.sigmoid(pos_embedding)
    assert out.shape == (batch, max_len, d_model)
    assert jnp.allclose(out, ref, atol=1e-6, rtol=1e-6)

    # 2) Non-(8,128)-aligned L and D: handled with full-extent blocks, no padding.
    b2, l2, d2 = 2, 20, 160
    pos2 = init_pos_embedding(k_pos2, l2, d2)
    x2 = jax.random.normal(k_x2, (b2, l2, d2), dtype=jnp.float32)
    out2 = jax.block_until_ready(positional_embedding_forward(x2, pos2))
    ref2 = x2 + jax.nn.sigmoid(pos2)
    assert out2.shape == (b2, l2, d2)
    assert jnp.allclose(out2, ref2, atol=1e-6, rtol=1e-6)

    # 3) Multi-tile sequence path (small tile_bytes forces TL=64 over L=256),
    #    exercising the per-tile sigmoid cache + batch reuse.
    b3, l3, d3 = 2, 256, 32
    pos3 = init_pos_embedding(k_pos3, l3, d3)
    x3 = jax.random.normal(k_x3, (b3, l3, d3), dtype=jnp.float32)
    out3 = jax.block_until_ready(
        positional_embedding_forward(x3, pos3, tile_bytes=1 << 13))
    ref3 = x3 + jax.nn.sigmoid(pos3)
    assert out3.shape == (b3, l3, d3)
    assert jnp.allclose(out3, ref3, atol=1e-6, rtol=1e-6)

    print("KERNEL_OK")
</pallas_src>

<mosaic_0001>
module attributes {stable_mosaic.version = 11 : i64} {
  func.func @_pos_embed_kernel(%arg0: i32, %arg1: i32, %arg2: memref<1x8x32xf32, #tpu.memory_space<vmem>>, %arg3: memref<1x8x32xf32, #tpu.memory_space<vmem>>, %arg4: memref<1x8x32xf32, #tpu.memory_space<vmem>>, %arg5: memref<1x8x32xf32, #tpu.memory_space<vmem>>) attributes {dimension_semantics = [#tpu.dimension_semantics<parallel>, #tpu.dimension_semantics<arbitrary>], iteration_bounds = array<i64: 1, 2>, scalar_prefetch = 0 : i64, scratch_operands = 1 : i64, tpu.core_type = #tpu.core_type<tc>, window_params = [{transform_indices = @transform_0, window_bounds = array<i64: 1, 8, 32>}, {transform_indices = @transform_1, window_bounds = array<i64: 1, 8, 32>}, {transform_indices = @transform_2, window_bounds = array<i64: 1, 8, 32>}]} {
    %c0_i32 = arith.constant 0 : i32
    %0 = arith.cmpi eq, %arg1, %c0_i32 : i32
    %1 = arith.extui %0 : i1 to i32
    %c0_i32_0 = arith.constant 0 : i32
    %2 = arith.cmpi ne, %1, %c0_i32_0 : i32
    scf.if %2 {
      %c0_9 = arith.constant 0 : index
      %c0_10 = arith.constant 0 : index
      %c0_11 = arith.constant 0 : index
      %7 = vector.load %arg3[%c0_9, %c0_10, %c0_11] : memref<1x8x32xf32, #tpu.memory_space<vmem>>, vector<1x8x32xf32>
      %8 = arith.negf %7 : vector<1x8x32xf32>
      %9 = math.exp %8 : vector<1x8x32xf32>
      %cst = arith.constant 1.000000e+00 : f32
      %10 = vector.broadcast %cst : f32 to vector<1x8x32xf32>
      %11 = arith.addf %10, %9 : vector<1x8x32xf32>
      %12 = arith.divf %10, %11 : vector<1x8x32xf32>
      %c0_12 = arith.constant 0 : index
      %c0_13 = arith.constant 0 : index
      %c0_14 = arith.constant 0 : index
      %13 = vector.load %arg5[%c0_12, %c0_13, %c0_14] : memref<1x8x32xf32, #tpu.memory_space<vmem>>, vector<1x8x32xf32>
      tpu.vector_store %arg5[%c0_12, %c0_13, %c0_14], %12 {strides = array<i32>} : memref<1x8x32xf32, #tpu.memory_space<vmem>>, vector<1x8x32xf32>,
    } else {
    }
    %c0 = arith.constant 0 : index
    %c0_1 = arith.constant 0 : index
    %c0_2 = arith.constant 0 : index
    %3 = vector.load %arg2[%c0, %c0_1, %c0_2] : memref<1x8x32xf32, #tpu.memory_space<vmem>>, vector<1x8x32xf32>
    %c0_3 = arith.constant 0 : index
    %c0_4 = arith.constant 0 : index
    %c0_5 = arith.constant 0 : index
    %4 = vector.load %arg5[%c0_3, %c0_4, %c0_5] : memref<1x8x32xf32, #tpu.memory_space<vmem>>, vector<1x8x32xf32>
    %5 = arith.addf %3, %4 : vector<1x8x32xf32>
    %c0_6 = arith.constant 0 : index
    %c0_7 = arith.constant 0 : index
    %c0_8 = arith.constant 0 : index
    %6 = vector.load %arg4[%c0_6, %c0_7, %c0_8] : memref<1x8x32xf32, #tpu.memory_space<vmem>>, vector<1x8x32xf32>
    tpu.vector_store %arg4[%c0_6, %c0_7, %c0_8], %5 {strides = array<i32>} : memref<1x8x32xf32, #tpu.memory_space<vmem>>, vector<1x8x32xf32>,
    return
  }
  func.func @transform_0(%arg0: i32, %arg1: i32) -> (i32, i32, i32) {
    %c0_i32 = arith.constant 0 : i32
    %c0_i32_0 = arith.constant 0 : i32
    return %arg1, %arg0, %c0_i32 : i32, i32, i32
  }
  func.func @transform_1(%arg0: i32, %arg1: i32) -> (i32, i32, i32) {
    %c0_i32 = arith.constant 0 : i32
    %c0_i32_0 = arith.constant 0 : i32
    %c0_i32_1 = arith.constant 0 : i32
    return %c0_i32, %arg0, %c0_i32_0 : i32, i32, i32
  }
  func.func @transform_2(%arg0: i32, %arg1: i32) -> (i32, i32, i32) {
    %c0_i32 = arith.constant 0 : i32
    %c0_i32_0 = arith.constant 0 : i32
    return %arg1, %arg0, %c0_i32 : i32, i32, i32
  }
}

</mosaic_0001>

<bundles_post_ra>
// kernel: positional_embedding_forward.1
= control target key start
LH: loop header
LB: loop body
LE: loop exit
PB: predicated region body
PF: predicated region fallthrough
CT: control target
= control target key end

     0   :  { %7 = vsyncpa [#allocation4], 0  ;;  %s741_s0 = inlined_call_operand.hbm [shape: f32[2,8,32], index: 0, kind: input, shape index: {}]   ;;  %s742_s1 = inlined_call_operand.hbm [shape: f32[1,8,32], index: 1, kind: input, shape index: {}]   ;;  %s743_s2 = inlined_call_operand.hbm [shape: f32[2,8,32], index: 2, kind: output, shape index: {}]  }
   0x1   :  { %9 = vsyncpa [#allocation4 + $0x1], 0 }
   0x2   :  { %10 = vsyncpa [#allocation7], 0 }
   0x3   :  { %11 = vsyncpa [#allocation5], 0 }
   0x4   :  { %13 = vsyncpa [#allocation5 + $0x1], 0  ;;  %s573_s9 = smov 0   ;;  %s575_s10 = smov 0  }
   0x5   :  { %s577_s11 = smov 0   ;;  %s579_s12 = smov 0  }
   0x6   :  { %s581_s13 = smov 0   ;;  %s583_s14 = smov 0  }
   0x7 LB: > { %s321_s15 = sadd.s32 4294967295, %s553_s14   ;;  %s322_s16 = sadd.s32 4294967294, %s553_s14   ;;  %s553_s14 = sphi %s583_s14, %s19_s14   ;;  %s549_s13 = sphi %s581_s13, %s760_s13   ;;  %s545_s12 = sphi %s579_s12, %s759_s12   ;;  %s541_s11 = sphi %s577_s11, %s758_s11   ;;  %s537_s10 = sphi %s575_s10, %s757_s10   ;;  %s533_s9 = sphi %s573_s9, %s756_s9  }
   0x8   : > { %p53_p0 = scmp.ne.s32.totalorder %s537_s10, %s533_s9  ;;  %p607_p1 = scmp.eq.s32.totalorder %s321_s15, 0 }
   0x9   : > { %p611_p2 = scmp.eq.s32.totalorder %s321_s15, 1  ;;  %p111_p3 = scmp.eq.s32.totalorder %s322_s16, 1 }
   0xa   : > { %p617_p4 = por %p607_p1, %p53_p0  ;;  %p323_p5 = scmp.ge.s32.totalorder %s553_s14, 1 }
   0xb   : > { %p622_p6 = por %p111_p3, %p53_p0  ;;  %p118_p7 = scmp.lt.s32.totalorder %s553_s14, 3 }
   0xc   : > { %s747_s19 = scalar_select %p617_p4, 1, 0 }
   0xd   : > { %s748_s20 = scalar_select %p622_p6, 1, 0 }
   0xe   : > { %p627_p8 = pnand %p323_p5, %p118_p7  ;;  %s555_s22 = smov [#allocation6]  }
   0xf   : > { %s133_s23 = sshll.u32 %s555_s22, 4  ;;  %s28_s25 = sadd.s32 1, %s549_s13  ;;  %s134_s23 = int_to_ptr.vmem [resolvable:$true] %s133_s23 }
  0x10   : > { %p346_p10 = pneg %p627_p8  ;;  %s40_s26 = sadd.s32 1, %s541_s11 }
  0x11   : > { %p29_p12 = scmp.ge.s32.totalorder %s28_s25, 2  ;;  %s426_s27 = scalar_lea.vmem %s134_s23, 128 }
  0x12   : > { %p636_p11 = pnand %p346_p10, %p607_p1  ;;  %p427_p0 = scmp.ne.s32.totalorder %s134_s23, %s426_s27 }
  0x13   : > { %p434_p7 = scmp.lt.s32.totalorder %s134_s23, %s134_s23  ;;  %p435_p6 = scmp.lt.s32.totalorder %s426_s27, %s426_s27 }
  0x14   : > { %p417_p13 = pneg %p636_p11 }
  0x15   : > { %p436_p9 = por %p435_p6, %p434_p7 }
  0x16   : > { %p429_p3 = pnand %p427_p0, %p417_p13 }
  0x18   : > { %p430_p5 = pneg %p429_p3 }
  0x1a   : > { %p437_p4 = pnand %p436_p9, %p430_p5 }
  0x1c   : > { %440 = shalt.err (!%p437_p4)
}
  0x1d   : > { %349 = dma.hbm_to_vmem [thread:$0]  (!%p636_p11), %s742_s1, 128, %s134_s23, [#allocation7]  }
  0x1e   : > { %s762_s25 = smov (%p29_p12, %s28_s25), 0  ;;  %p47_p6 = scmp.ne.s32.totalorder %s541_s11, %s537_s10 }
  0x1f   : > { %p48_p4 = scmp.eq.s32.totalorder %s553_s14, 0  ;;  %s35_s30 = ssub.s32 %s549_s13, %s762_s25 }
  0x20   : > { %p359_p9 = scmp.lt.s32.totalorder %s553_s14, 2  ;;  %p38_p10 = scmp.eq.s32.totalorder %s35_s30, 0 }
  0x21   : > { %p49_p13 = por %p48_p4, %p47_p6  ;;  %p659_p0 = por %p611_p2, %p47_p6 }
  0x22   : > { %s144_s4 = sand.u32 1, %s541_s11   ;;  %s327_s7 = sshll.u32 %s549_s13, 7 }
  0x23   : > { %s665_s5 = scalar_select %p38_p10, %s541_s11, %s40_s26  }
  0x24   : > { %s326_s6 = sshll.u32 %s144_s4, 3  ;;  %s154_s16 = scalar_lea.hbm %s741_s0, %s327_s7 }
  0x25   : > { %s148_s22 = scalar_lea.vmem [#allocation3], %s326_s6  ;;  %p671_p11 = pnand %p359_p9, %p49_p13 }
  0x26   : > { %s156_s23 = sshll.u32 %s148_s22, 4  ;;  %s145_s18 = scalar_lea.sflag [#allocation4], %s144_s4  ;;  %s157_s23 = int_to_ptr.vmem [resolvable:$true] %s156_s23 }
  0x27   : > { %p443_p2 = pneg %p671_p11  ;;  %s454_s27 = scalar_lea.vmem %s157_s23, 128 }
  0x28   : > { %p455_p12 = scmp.ne.s32.totalorder %s157_s23, %s454_s27  ;;  %s556_s26 = smov [#allocation3]  }
  0x29   : > { %s459_s28 = sshll.u32 %s556_s26, 4  ;;  %s460_s28 = int_to_ptr.vmem [resolvable:$false] %s459_s28 }
  0x2a   : > { %p457_p3 = pnand %p455_p12, %p443_p2  ;;  %s461_s29 = scalar_lea.vmem %s460_s28, 256 }
  0x2b   : > { %p462_p7 = scmp.lt.s32.totalorder %s157_s23, %s460_s28  ;;  %p463_p6 = scmp.lt.s32.totalorder %s461_s29, %s454_s27 }
  0x2c   : > { %p458_p5 = pneg %p457_p3 }
  0x2d   : > { %p464_p4 = por %p463_p6, %p462_p7 }
  0x2f   : > { %p465_p10 = pnand %p464_p4, %p458_p5 }
  0x31   : > { %468 = shalt.err (!%p465_p10)
}
  0x32   : > { %353 = dma.hbm_to_vmem [thread:$0]  (!%p671_p11), %s154_s16, 128, %s157_s23, %s145_s18  }
  0x33   : > { %165 = sbr.rel (%p627_p8) target bundleno = 123 (0x7b), region = 28  ;;  %s682_s30 = sand.u32 (!%p627_p8), 1, %s537_s10  }
  0x34   : > { %s329_s4 = sshll.u32 (!%p627_p8), %s682_s30, 3  ;;  %s168_s6 = scalar_lea.sflag (!%p627_p8), [#allocation4], %s682_s30 }
  0x35   : > { %s171_s7 = scalar_lea.vmem (!%p627_p8), [#allocation3], %s329_s4  ;;  %p753_p9 = scmp.ne.s32.totalorder (!%p627_p8), %s747_s19, 0 }
  0x38   : > { %520 = dma.done.wait (%p753_p9), %s168_s6, 128  }
  0x39   : > { %522 = vsyncadd (%p753_p9), %s168_s6, 4294967168 }
  0x3a   : > { %524 = dma.done.wait (%p607_p1), [#allocation7], 128  }
  0x3b   : > { %526 = vsyncadd (%p607_p1), [#allocation7], 4294967168  ;;  %s195_s21 = scalar_lea.vmem [#allocation8], %s329_s4  ;;  %p332_p8 = scmp.ne.s32.totalorder %s545_s12, 0 }
  0x3d   : > { %199 = sbr.rel (%p332_p8) target bundleno = 100 (0x64), region = 40 }
  0x42   : > { %v200_v0 = vld [vmem:[#allocation6] sm:$0xff]  ;;  %vm207_vm0 = vcmask 261120  }
  0x43   : > { %v333_v1 = vmul.f32 -1.442695, %v200_v0 }
  0x45   : > { %411 = vpow2.f32 %v333_v1 }
  0x52   : > { %v412_v2 = vpop.eup %411 }
  0x53   : > { %v204_v3 = vadd.f32 1.0, %v412_v2 }
  0x55   : > { %413 = vrcp.f32 %v204_v3 }
  0x62   : > { %v414_v4 = vpop.eup %413 }
  0x63   : > { %208 = vst.msk [vmem:[#allocation2] sm:$0xff] %vm207_vm0, %v414_v4 }
  0x64 PF: > { %v209_v5 = vld [vmem:[%s171_s7] sm:$0xff]  ;;  %vm212_vm1 = vcmask 261120   ;;  %s335_s17 = sshll.u32 %s545_s12, 7  ;;  %s229_s16 = sshll.u32 %s195_s21, 4  ;;  %s230_s16 = int_to_ptr.vmem [resolvable:$true] %s229_s16 }
  0x65   : > { %s699_s15 = scalar_lea.hbm %s743_s2, %s335_s17  ;;  %s215_s22 = scalar_lea.sflag [#allocation5], %s682_s30 }
  0x66   : > { %s469_s23 = scalar_lea.vmem %s230_s16, 128  ;;  %s557_s24 = smov [#allocation8]  }
  0x67   : > { %p470_p1 = scmp.ne.s32.totalorder %s230_s16, %s469_s23  ;;  %s473_s18 = sshll.u32 %s557_s24, 4  ;;  %s474_s18 = int_to_ptr.vmem [resolvable:$false] %s473_s18 }
  0x68   : > { %s475_s27 = scalar_lea.vmem %s474_s18, 256  ;;  %p476_p2 = scmp.lt.s32.totalorder %s230_s16, %s474_s18 }
  0x69   : > { %p471_p13 = pnand %p470_p1, %p659_p0  ;;  %p477_p12 = scmp.lt.s32.totalorder %s475_s27, %s469_s23 }
  0x6a   : > { %v210_v6 = vld [vmem:[#allocation2] sm:$0xff] }
  0x6b   : > { %v211_v7 = vadd.f32 %v210_v6, %v209_v5  ;;  %p472_p11 = pneg %p471_p13  ;;  %p478_p3 = por %p477_p12, %p476_p2 }
  0x6d   : > { %213 = vst.msk [vmem:[%s195_s21] sm:$0xff] %vm212_vm1, %v211_v7  ;;  %p479_p5 = pnand %p478_p3, %p472_p11 }
  0x6f   : > { %482 = shalt.err (!%p479_p5)
}
  0x70   : > { %s483_s12 = scalar_lea.hbm %s699_s15, 128  ;;  %s487_s29 = scalar_lea.hbm %s743_s2, 256 }
  0x71   : > { %p484_p7 = scmp.ne.s32.totalorder %s699_s15, %s483_s12  ;;  %p488_p10 = scmp.lt.s32.totalorder %s699_s15, %s743_s2 }
  0x72   : > { %p489_p9 = scmp.lt.s32.totalorder %s487_s29, %s483_s12 }
  0x73   : > { %p485_p6 = pnand %p484_p7, %p659_p0 }
  0x74   : > { %p490_p8 = por %p489_p9, %p488_p10 }
  0x75   : > { %p486_p4 = pneg %p485_p6 }
  0x77   : > { %p491_p1 = pnand %p490_p8, %p486_p4 }
  0x79   : > { %494 = shalt.err (!%p491_p1)
}
  0x7a   : > { %344 = dma.vmem_to_hbm [thread:$0]  (%p659_p0), %s230_s16, 128, %s699_s15, %s215_s22  }
  0x7b PF: > { %s241_s6 = sand.u32 1, %s533_s9   ;;  %p754_p13 = scmp.ne.s32.totalorder %s748_s20, 0 }
  0x7c   : > { %p755_p11 = scmp.ge.s32.totalorder %s553_s14, 2  ;;  %s242_s7 = scalar_lea.sflag [#allocation5], %s241_s6 }
  0x7e   : > { %p355_p2 = pnand %p755_p11, %p754_p13 }
  0x80   : > { %p356_p12 = pneg %p355_p2 }
  0x82   : > { %528 = dma.done.wait (%p356_p12), %s242_s7, 128  }
  0x83   : > { %530 = vsyncadd (%p356_p12), %s242_s7, 4294967168  ;;  %s19_s14 = sadd.s32 1, %s553_s14   ;;  %s756_s9 = smov %s537_s10 }
  0x84   : > { %p16_p3 = scmp.ge.s32.totalorder %s19_s14, 4   ;;  %s757_s10 = smov %s541_s11 }
  0x85   : > { %s758_s11 = smov %s665_s5  ;;  %s759_s12 = smov %s549_s13 }
  0x86   : > { %s760_s13 = smov %s762_s25  ;;  %18 = sbr.rel (!%p16_p3) target bundleno = 7 (0x7), region = 82 }
  0x8b   :  { %247 = vsyncpa [#allocation4], 1 }
  0x8c   :  { %249 = vsyncpa [#allocation4 + $0x1], 1 }
  0x8d   :  { %250 = vsyncpa [#allocation7], 1 }
  0x8e   :  { %251 = vsyncpa [#allocation5], 1 }
  0x8f   :  { %253 = vsyncpa [#allocation5 + $0x1], 1 }

</bundles_post_ra>
